<compile_context>
chip_gen: v7x
topology: tpu7x:2x2x1
jax: 0.10.0
libtpu: 0.0.40
codegen_flags: <defaults>
</compile_context>

<pallas_src>
import jax
import jax.numpy as jnp
from jax import lax
from jax.experimental import pallas as pl
from jax.experimental.pallas import tpu as pltpu

NUM_EMOTIONS = 7
EMBED_DIM = 512
_ONE_HOT_SUB = 256          # rows per one-hot sub-chunk inside a batch tile


def _round_up(x, m):
    return (x + m - 1) // m * m


def _embedding_kernel(idx_ref, table_ref, out_ref):
    # idx_ref:   (TB, 1)          int32   VMEM
    # table_ref: (8, EMBED_DIM)   float32 VMEM (row 7 is zero padding; constant
    #                             index_map keeps it resident across steps)
    # out_ref:   (TB, EMBED_DIM)  VMEM
    tb = out_ref.shape[0]
    n_emb = table_ref.shape[0]                      # 8 (padded, sublane aligned)
    table = table_ref[...]                          # (8, 512), ~4 vregs

    sub = _ONE_HOT_SUB if (tb % _ONE_HOT_SUB == 0 and tb > _ONE_HOT_SUB) else tb
    n_sub = tb // sub

    def body(c, carry):
        r0 = pl.multiple_of(c * sub, sub)
        idx = idx_ref[pl.ds(r0, sub), :]            # (sub, 1)
        emb_iota = lax.broadcasted_iota(jnp.int32, (sub, n_emb), 1)
        one_hot = (emb_iota == idx).astype(table.dtype)      # (sub, 8), exact 0/1
        out_ref[pl.ds(r0, sub), :] = jnp.dot(
            one_hot, table, preferred_element_type=jnp.float32
        ).astype(out_ref.dtype)
        return carry

    if n_sub == 1:
        body(0, 0)
    else:
        # fori_loop (not unrolled) bounds the live range of the lane-padded
        # (sub, 8) intermediates; loop overhead is negligible vs the 512 KiB
        # per-chunk HBM writeback.
        lax.fori_loop(0, n_sub, body, 0)


def emotion_embedding_lookup(emotion_index, embedding_table, *,
                             block_b=1024, min_pallas_batch=2048,
                             out_dtype=None):
    """emotion_index: (B,) int; embedding_table: (7, 512) f32 -> (B, 512)."""
    b = emotion_index.shape[0]
    idx = emotion_index.astype(jnp.int32)
    out_dtype = embedding_table.dtype if out_dtype is None else out_dtype

    # Small batches: pallas_call launch / per-step pipeline overhead dwarfs the
    # useful bytes; XLA's native gather on the 16 KiB table wins.
    if b < min_pallas_batch:
        return embedding_table[idx].astype(out_dtype)

    n_emb, d = embedding_table.shape

    # Pad table rows 7 -> 8 (sublane group). The zero pad row is never selected
    # for valid indices 0..6.
    n_emb_pad = _round_up(n_emb, 8)
    table = embedding_table
    if n_emb_pad != n_emb:
        table = jnp.pad(embedding_table, ((0, n_emb_pad - n_emb), (0, 0)))

    # Rows per grid step. Big tiles amortize per-step overhead (HBM-bound);
    # cap so the grid has >= 2 steps (keeps both v7x TensorCores busy when the
    # "parallel" axis is sharded) and keep tb a multiple of the sub-chunk size
    # when large so in-kernel chunking divides evenly.
    tb = min(block_b, b)
    tb = min(tb, _round_up(pl.cdiv(b, 2), 8))
    if tb >= 2 * _ONE_HOT_SUB:
        tb = (tb // _ONE_HOT_SUB) * _ONE_HOT_SUB
    else:
        tb = _round_up(tb, 8)
    grid = (pl.cdiv(b, tb),)

    idx2d = idx.reshape(b, 1)

    itemsize = jnp.dtype(out_dtype).itemsize
    cost = pl.CostEstimate(
        flops=2 * b * n_emb_pad * d,
        transcendentals=0,
        bytes_accessed=b * d * itemsize + b * 4 + n_emb_pad * d * 4,
    )

    # No batch padding: out_shape is exactly (B, d). A ragged last block is
    # masked by Pallas (OOB idx reads are unspecified but only produce output
    # rows that are discarded on writeback), so there is no post-kernel slice.
    out = pl.pallas_call(
        _embedding_kernel,
        out_shape=jax.ShapeDtypeStruct((b, d), out_dtype),
        grid=grid,
        in_specs=[
            pl.BlockSpec((tb, 1), lambda i: (i, 0)),
            # Constant index_map -> 16 KiB table fetched once, stays resident.
            pl.BlockSpec((n_emb_pad, d), lambda i: (0, 0)),
        ],
        out_specs=pl.BlockSpec((tb, d), lambda i: (i, 0)),
        compiler_params=pltpu.CompilerParams(
            # Only matters on v7x (2 TCs); no-op on single-TC v5e/v6e.
            dimension_semantics=("parallel",),
        ),
        cost_estimate=cost,
    )(idx2d, table)
    return out


class EmotionModelPallas:
    """JAX/Pallas equivalent of the PyTorch EmotionModel."""

    def __init__(self, key):
        # nn.Embedding default init: N(0, 1)
        self.emotion_embeddings = jax.random.normal(
            key, (NUM_EMOTIONS, EMBED_DIM), dtype=jnp.float32
        )

    def __call__(self, emotion_index, *, block_b=1024, out_dtype=None):
        return emotion_embedding_lookup(
            emotion_index, self.emotion_embeddings,
            block_b=block_b, out_dtype=out_dtype,
        )


if __name__ == "__main__":
    key = jax.random.PRNGKey(0)
    k_param, k_idx1, k_idx2, k_idx3 = jax.random.split(key, 4)

    model = EmotionModelPallas(k_param)

    # (a) Pallas path, evenly tiled: 4096 rows -> 4 grid steps of 1024.
    b1 = 4096
    idx1 = jax.random.randint(k_idx1, (b1,), 0, NUM_EMOTIONS, dtype=jnp.int32)
    out1 = jax.block_until_ready(model(idx1))
    ref1 = model.emotion_embeddings[idx1]
    assert out1.shape == (b1, EMBED_DIM)
    assert jnp.allclose(out1, ref1, atol=1e-6), "pallas path mismatch"

    # (b) Pallas path with a ragged tail (B not a multiple of the tile):
    #     exercises the masked partial last block (no post-kernel slice copy).
    b2 = 2051
    idx2 = jax.random.randint(k_idx2, (b2,), 0, NUM_EMOTIONS, dtype=jnp.int32)
    out2 = jax.block_until_ready(model(idx2))
    ref2 = model.emotion_embeddings[idx2]
    assert out2.shape == (b2, EMBED_DIM)
    assert jnp.allclose(out2, ref2, atol=1e-6), "ragged-tail mismatch"

    # (c) Small batch: stays on XLA's native gather (kernel is pure overhead
    #     below ~2K rows).
    b3 = 8
    idx3 = jax.random.randint(k_idx3, (b3,), 0, NUM_EMOTIONS, dtype=jnp.int32)
    out3 = jax.block_until_ready(model(idx3))
    assert out3.shape == (b3, EMBED_DIM)
    assert jnp.allclose(out3, model.emotion_embeddings[idx3], atol=1e-6)

    # NOTE: like the one-hot formulation, out-of-range indices (>=7 or <0)
    # produce all-zero rows instead of raising, unlike PyTorch's index check.
    print("KERNEL_OK")
</pallas_src>

<mosaic_0001>
module attributes {stable_mosaic.version = 11 : i64} {
  func.func @_embedding_kernel(%arg0: i32, %arg1: memref<1024x1xi32, #tpu.memory_space<vmem>>, %arg2: memref<8x512xf32, #tpu.memory_space<vmem>>, %arg3: memref<1024x512xf32, #tpu.memory_space<vmem>>) attributes {dimension_semantics = [#tpu.dimension_semantics<parallel>], iteration_bounds = array<i64: 4>, scalar_prefetch = 0 : i64, scratch_operands = 0 : i64, tpu.core_type = #tpu.core_type<tc>, window_params = [{transform_indices = @transform_0, window_bounds = array<i64: 1024, 1>}, {pipeline_mode = #tpu.pipeline_mode<synchronous>, transform_indices = @transform_1, window_bounds = array<i64: 8, 512>}, {transform_indices = @transform_2, window_bounds = array<i64: 1024, 512>}]} {
    %c0 = arith.constant 0 : index
    %c0_0 = arith.constant 0 : index
    %0 = vector.load %arg2[%c0, %c0_0] : memref<8x512xf32, #tpu.memory_space<vmem>>, vector<8x512xf32>
    %c0_i32 = arith.constant 0 : i32
    %c4_i32 = arith.constant 4 : i32
    %1 = arith.addi %c0_i32, %c4_i32 : i32
    %c1_i32 = arith.constant 1 : i32
    scf.for %arg4 = %c0_i32 to %1 step %c1_i32  : i32 {
      %c256_i32 = arith.constant 256 : i32
      %2 = arith.muli %arg4, %c256_i32 : i32
      %3 = tpu.assume_multiple %2, 256 : i32
      %4 = arith.index_cast %3 : i32 to index
      %c0_2 = arith.constant 0 : index
      %5 = vector.load %arg1[%4, %c0_2] : memref<1024x1xi32, #tpu.memory_space<vmem>>, vector<256x1xi32>
      %6 = tpu.iota {dimensions = array<i32: 1>} : vector<256x8xi32>
      %7 = vector.broadcast %5 : vector<256x1xi32> to vector<256x8xi32>
      %8 = arith.cmpi eq, %6, %7 : vector<256x8xi32>
      %9 = arith.extui %8 : vector<256x8xi1> to vector<256x8xi32>
      %10 = arith.sitofp %9 : vector<256x8xi32> to vector<256x8xf32>
      %cst = arith.constant dense<0.000000e+00> : vector<256x512xf32>
      %11 = tpu.matmul %10, %0, %cst {dimension_numbers = #tpu.dot_dimension_numbers<[1], [0], [0], [1], [0, 0, 1, 1], [], []>} : vector<256x8xf32>, vector<8x512xf32>, vector<256x512xf32> -> vector<256x512xf32>
      %12 = arith.index_cast %3 : i32 to index
      %c0_3 = arith.constant 0 : index
      %13 = vector.load %arg3[%12, %c0_3] : memref<1024x512xf32, #tpu.memory_space<vmem>>, vector<256x512xf32>
      tpu.vector_store %arg3[%12, %c0_3], %11 {strides = array<i32>} : memref<1024x512xf32, #tpu.memory_space<vmem>>, vector<256x512xf32>,
    }
    %c4_i32_1 = arith.constant 4 : i32
    return
  }
  func.func @transform_0(%arg0: i32) -> (i32, i32) {
    %c0_i32 = arith.constant 0 : i32
    %c0_i32_0 = arith.constant 0 : i32
    return %arg0, %c0_i32 : i32, i32
  }
  func.func @transform_1(%arg0: i32) -> (i32, i32) {
    %c0_i32 = arith.constant 0 : i32
    %c0_i32_0 = arith.constant 0 : i32
    %c0_i32_1 = arith.constant 0 : i32
    return %c0_i32, %c0_i32_0 : i32, i32
  }
  func.func @transform_2(%arg0: i32) -> (i32, i32) {
    %c0_i32 = arith.constant 0 : i32
    %c0_i32_0 = arith.constant 0 : i32
    return %arg0, %c0_i32 : i32, i32
  }
}

</mosaic_0001>

<bundles_post_ra>
// kernel: tpu_custom_call.1
= control target key start
LH: loop header
LB: loop body
LE: loop exit
PB: predicated region body
PF: predicated region fallthrough
CT: control target
= control target key end

     0   :  { %7 = vsyncpa [#allocation3], 0  ;;  %s2078_s0 = inlined_call_operand.vmem [shape: s32[4096,1], index: 0, kind: input, shape index: {}]   ;;  %s2079_s1 = inlined_call_operand.hbm [shape: f32[8,512], index: 1, kind: input, shape index: {}]   ;;  %s2080_s2 = inlined_call_operand.hbm [shape: f32[4096,512], index: 2, kind: output, shape index: {}]  }
   0x1   :  { %8 = vsyncpa [#allocation4], 0 }
   0x2   :  { %10 = vsyncpa [#allocation4 + $0x1], 0  ;;  %s1544_s9 = smov 0   ;;  %s1546_s10 = smov 0  }
   0x3   :  { %s1548_s11 = smov 0   ;;  %s1550_s12 = smov 0  }
   0x4 LB: > { %s1565_s13 = sadd.s32 4294967295, %s1517_s12   ;;  %s1238_s14 = sadd.s32 4294967294, %s1517_s12   ;;  %s1517_s12 = sphi %s1550_s12, %s2096_s12   ;;  %s1513_s11 = sphi %s1548_s11, %s2095_s11   ;;  %s1509_s10 = sphi %s1546_s10, %s2094_s10   ;;  %s1505_s9 = sphi %s1544_s9, %s2093_s9  }
   0x5   : > { %s1569_s15 = sadd.s32 1, %s1517_s12   ;;  %s70_s16 = sadd.s32 1, %s1513_s11 }
   0x6   : > { %s67_s17 = ssub.s32 %s1517_s12, %s1569_s15  ;;  %p80_p0 = scmp.ne.s32.totalorder %s1513_s11, %s1509_s10 }
   0x7   : > { %p68_p1 = scmp.eq.s32.totalorder %s67_s17, 0  ;;  %p81_p2 = scmp.eq.s32.totalorder %s1565_s13, 3 }
   0x8   : > { %p86_p3 = scmp.ne.s32.totalorder %s1509_s10, %s1505_s9  ;;  %p87_p4 = scmp.eq.s32.totalorder %s1238_s14, 3 }
   0x9   : > { %s1580_s18 = scalar_select %p68_p1, %s1513_s11, %s70_s16  }
   0xa   : > { %p1582_p5 = por %p81_p2, %p80_p0  ;;  %p1586_p6 = por %p87_p4, %p86_p3 }
   0xb   : > { %p1239_p7 = scmp.ge.s32.totalorder %s1517_s12, 1  ;;  %p94_p8 = scmp.lt.s32.totalorder %s1517_s12, 5 }
   0xc   : > { %s2084_s19 = scalar_select %p1582_p5, 1, 0 }
   0xd   : > { %s2085_s20 = scalar_select %p1586_p6, 1, 0 }
   0xe   : > { %p2081_p9 = scmp.eq.s32.totalorder %s1565_s13, 0  ;;  %p1593_p10 = pnand %p1239_p7, %p94_p8 }
   0xf   : > { %s1523_s22 = smov [#allocation2]   ;;  %s1419_s27 = scalar_lea.hbm %s2079_s1, 512 }
  0x10   : > { %s2086_s21 = scalar_select %p1593_p10, 1, 0 }
  0x11   : > { %s107_s23 = sshll.u32 %s1523_s22, 4  ;;  %p1361_p11 = pneg %p1593_p10  ;;  %s108_s23 = int_to_ptr.vmem [resolvable:$true] %s107_s23 }
  0x12   : > { %p1420_p13 = scmp.ne.s32.totalorder %s2079_s1, %s1419_s27  ;;  %p1426_p3 = scmp.lt.u32.totalorder %s1419_s27, %s2079_s1 }
  0x13   : > { %p1601_p12 = pnand %p2081_p9, %p1361_p11 }
  0x15   : > { %p1421_p0 = pneg %p1601_p12 }
  0x17   : > { %p1422_p1 = pnand %p1421_p0, %p1420_p13 }
  0x19   : > { %p1423_p2 = pneg %p1422_p1 }
  0x1b   : > { %p1428_p4 = pnand %p1426_p3, %p1423_p2 }
  0x1d   : > { %1431 = shalt.err (!%p1428_p4)
}
  0x1e   : > { %s1432_s4 = scalar_lea.vmem %s108_s23, 512  ;;  %p1440_p9 = scmp.lt.s32.totalorder %s108_s23, %s108_s23 }
  0x1f   : > { %p1433_p7 = scmp.ne.s32.totalorder %s108_s23, %s1432_s4  ;;  %p1441_p6 = scmp.lt.s32.totalorder %s1432_s4, %s1432_s4 }
  0x21   : > { %p1435_p8 = pnand %p1433_p7, %p1421_p0  ;;  %p1442_p5 = por %p1441_p6, %p1440_p9 }
  0x23   : > { %p1436_p11 = pneg %p1435_p8 }
  0x25   : > { %p1443_p10 = pnand %p1442_p5, %p1436_p11 }
  0x27   : > { %1446 = shalt.err (!%p1443_p10)
}
  0x28   : > { %1364 = dma.hbm_to_vmem [thread:$0]  (!%p1601_p12), %s2079_s1, 512, %s108_s23, [#allocation3]  }
  0x29   : > { %p2088_p13 = scmp.ne.s32.totalorder %s2086_s21, 0 }
  0x2a   : > { %p2089_p1 = scmp.eq.s32.totalorder (!%p2088_p13), %s1565_s13, 0 }
  0x2b   : > { %129 = sbr.rel (%p2088_p13) target bundleno = 543 (0x21f), region = 28 }
  0x32   : > { %1496 = dma.done.wait (%p2089_p1), [#allocation3], 512   ;;  %p2090_p0 = pmov %p2089_p1 }
  0x33   : > { %s148_s7 = sand.u32 1, %s1509_s10   ;;  %s1245_s8 = sshll.u32 %s1565_s13, 7  ;;  %v1638_v0 = vld [vmem:[#allocation2] sm:$0xff]  ;;  %v1640_v1 = vld [vmem:[#allocation2 + $0x8] sm:$0xff]  ;;  %v1642_v2 = vld [vmem:[#allocation2 + $0x10] sm:$0xff] }
  0x34   : > { %1498 = vsyncadd (%p2090_p0), [#allocation3], 4294966784  ;;  %s1631_s14 = sshll.u32 %s148_s7, 12  ;;  %p152_p5 = scmp.lt.s32.totalorder %s1245_s8, 511  ;;  %v1644_v3 = vld [vmem:[#allocation2 + $0x18] sm:$0xff] }
  0x35   : > { %s150_s23 = scalar_lea.vmem [#allocation5], %s1631_s14  ;;  %s1647_s24 = smov 0  }
  0x36   : > { %s2098_s8 = smov (!%p152_p5, %s1245_s8), 511 }
  0x37   : > { %s1246_s16 = sshll.u32 %s2098_s8, 3 }
  0x38   : > { %s1636_s22 = scalar_lea.vmem %s2078_s0, %s1246_s16 }
  0x39 LB: >> { %493 = vmatprep.subr.mxu0 %v1640_v1  ;;  %750 = vmatprep.subr.mxu1 %v1644_v3  ;;  %v1524_v4 = vmov 0   ;;  %s1247_s25 = sshll.u32 %s1521_s24, 8  ;;  %v1525_v5 = vmov 0.0   ;;  %v202_v38 = vlaneseq  ;;  %vm396_vm0 = vcmask 64512   ;;  %s167_s24 = sadd.s32 1, %s1521_s24   ;;  %s1521_s24 = sphi %s1647_s24, %s167_s24  }
  0x3a   : >> { %1418 = vset.pattern.permute.xlu1 %v1524_v4  ;;  %1417 = vset.pattern.permute.xlu0 %v1524_v4  ;;  %s1660_s26 = scalar_lea.vmem %s1636_s22, %s1247_s25  ;;  %s1007_s27 = sshra.s32 %s1247_s25, 3 }
  0x3b   : >> { %494 = vmatpush1.msra.mxu0 %v1638_v0  ;;  %557 = vmatprep.mubr.f32.mxu0 %v1525_v5  ;;  %v172_v6 = vld [vmem:[%s1660_s26 + $0x10] sm:$0xff]  ;;  %v170_v7 = vld [vmem:[%s1660_s26] sm:$0xff]  ;;  %v173_v8 = vld [vmem:[%s1660_s26 + $0x18] sm:$0xff]  ;;  %v1696_v39 = vand.u32 127, %v202_v38  ;;  %s1352_s28 = sshll.u32 %s1007_s27, 5  ;;  %p164_p6 = scmp.ge.s32.totalorder %s167_s24, 4  }
  0x3c   : >> { %751 = vmatpush1.msra.mxu1 %v1642_v2  ;;  %814 = vmatprep.mubr.f32.mxu1 %v1525_v5  ;;  %v171_v9 = vld [vmem:[%s1660_s26 + $0x8] sm:$0xff]  ;;  %v174_v11 = vld [vmem:[%s1660_s26 + $0x20] sm:$0xff]  ;;  %v177_v12 = vld [vmem:[%s1660_s26 + $0x38] sm:$0xff]  ;;  %s1892_s29 = scalar_lea.vmem %s150_s23, %s1352_s28 [#allocation5]  ;;  %s1354_s30 = sshll.u32 (%p164_p6), %s1565_s13, 16 }
  0x3d   : >> { %211 = vperm.xlu1 %1418, %v172_v6   ;;  %205 = vperm.xlu0 %1417, %v170_v7   ;;  %v175_v10 = vld [vmem:[%s1660_s26 + $0x28] sm:$0xff]  ;;  %v176_v13 = vld [vmem:[%s1660_s26 + $0x30] sm:$0xff]  ;;  %v178_v15 = vld [vmem:[%s1660_s26 + $0x40] sm:$0xff]  ;;  %s2029_s5 = scalar_lea.hbm (%p164_p6), %s2080_s2, %s1354_s30  ;;  %s1155_s6 = sshll.u32 (%p164_p6), %s150_s23, 4  ;;  %s2033_s6 = int_to_ptr.vmem [resolvable:$true] %s1155_s6 }
  0x3e   : >> { %v179_v14 = vld [vmem:[%s1660_s26 + $0x48] sm:$0xff]  ;;  %v181_v16 = vld [vmem:[%s1660_s26 + $0x58] sm:$0xff]  ;;  %v180_v17 = vld [vmem:[%s1660_s26 + $0x50] sm:$0xff]  ;;  %s2037_s8 = scalar_lea.sflag (%p164_p6), [#allocation4], %s148_s7  ;;  %s1447_s16 = scalar_lea.vmem (%p164_p6), %s2033_s6, 65536 }
  0x3f   : >> { %v183_v18 = vld [vmem:[%s1660_s26 + $0x68] sm:$0xff]  ;;  %v182_v19 = vld [vmem:[%s1660_s26 + $0x60] sm:$0xff]  ;;  %v185_v20 = vld [vmem:[%s1660_s26 + $0x78] sm:$0xff]  ;;  %p1448_p9 = scmp.ne.s32.totalorder (%p164_p6), %s2033_s6, %s1447_s16  ;;  %p2091_p10 = scmp.ne.s32.totalorder (%p164_p6), %s2084_s19, 0 }
  0x40   : >> { %v184_v21 = vld [vmem:[%s1660_s26 + $0x70] sm:$0xff]  ;;  %v187_v22 = vld [vmem:[%s1660_s26 + $0x88] sm:$0xff]  ;;  %v186_v23 = vld [vmem:[%s1660_s26 + $0x80] sm:$0xff]  ;;  %s1526_s13 = smov (%p164_p6), [#allocation5]  }
  0x41   : >> { %214 = vperm.xlu1 %1418, %v173_v8   ;;  %208 = vperm.xlu0 %1417, %v171_v9   ;;  %v189_v24 = vld [vmem:[%s1660_s26 + $0x98] sm:$0xff]  ;;  %v188_v25 = vld [vmem:[%s1660_s26 + $0x90] sm:$0xff]  ;;  %v191_v26 = vld [vmem:[%s1660_s26 + $0xa8] sm:$0xff]  ;;  %p1449_p12 = pnand (%p164_p6), %p1448_p9, %p2091_p10  ;;  %s1451_s17 = sshll.u32 (%p164_p6), %s1526_s13, 4  ;;  %s1452_s17 = int_to_ptr.vmem [resolvable:$false] %s1451_s17 }
  0x42   : >> { %v190_v27 = vld [vmem:[%s1660_s26 + $0xa0] sm:$0xff]  ;;  %v193_v28 = vld [vmem:[%s1660_s26 + $0xb8] sm:$0xff]  ;;  %v192_v29 = vld [vmem:[%s1660_s26 + $0xb0] sm:$0xff]  ;;  %s1453_s21 = scalar_lea.vmem (%p164_p6), %s1452_s17, 131072  ;;  %p1454_p3 = scmp.lt.s32.totalorder (%p164_p6), %s2033_s6, %s1452_s17 }
  0x43   : >> { %v195_v30 = vld [vmem:[%s1660_s26 + $0xc8] sm:$0xff]  ;;  %v194_v31 = vld [vmem:[%s1660_s26 + $0xc0] sm:$0xff]  ;;  %v197_v32 = vld [vmem:[%s1660_s26 + $0xd8] sm:$0xff]  ;;  %p1450_p2 = pneg (%p164_p6), %p1449_p12  ;;  %p1455_p4 = scmp.lt.s32.totalorder (%p164_p6), %s1453_s21, %s1447_s16 }
  0x44   : >> { %v196_v33 = vld [vmem:[%s1660_s26 + $0xd0] sm:$0xff]  ;;  %v199_v34 = vld [vmem:[%s1660_s26 + $0xe8] sm:$0xff]  ;;  %v198_v35 = vld [vmem:[%s1660_s26 + $0xe0] sm:$0xff] }
  0x45   : >> { %220 = vperm.xlu1 %1418, %v175_v10   ;;  %217 = vperm.xlu0 %1417, %v174_v11   ;;  %v201_v36 = vld [vmem:[%s1660_s26 + $0xf8] sm:$0xff]  ;;  %v200_v37 = vld [vmem:[%s1660_s26 + $0xf0] sm:$0xff]  ;;  %p1456_p7 = por (%p164_p6), %p1455_p4, %p1454_p3 }
  0x47   : > { %p1457_p8 = pnand (%p164_p6), %p1456_p7, %p1450_p2 }
  0x49   : >> { %226 = vperm.xlu1 %1418, %v177_v12   ;;  %223 = vperm.xlu0 %1417, %v176_v13  }
  0x4d   : >> { %232 = vperm.xlu1 %1418, %v179_v14   ;;  %229 = vperm.xlu0 %1417, %v178_v15  }
  0x51   : >> { %238 = vperm.xlu1 %1418, %v181_v16   ;;  %235 = vperm.xlu0 %1417, %v180_v17  }
  0x55   : >> { %244 = vperm.xlu1 %1418, %v183_v18   ;;  %241 = vperm.xlu0 %1417, %v182_v19  }
  0x59   : >> { %250 = vperm.xlu1 %1418, %v185_v20   ;;  %247 = vperm.xlu0 %1417, %v184_v21  }
  0x5d   : >> { %256 = vperm.xlu1 %1418, %v187_v22   ;;  %253 = vperm.xlu0 %1417, %v186_v23  }
  0x61   : >> { %262 = vperm.xlu1 %1418, %v189_v24   ;;  %259 = vperm.xlu0 %1417, %v188_v25  }
  0x65   : >> { %268 = vperm.xlu1 %1418, %v191_v26   ;;  %265 = vperm.xlu0 %1417, %v190_v27  }
  0x69   : >> { %274 = vperm.xlu1 %1418, %v193_v28   ;;  %271 = vperm.xlu0 %1417, %v192_v29  }
  0x6d   : >> { %280 = vperm.xlu1 %1418, %v195_v30   ;;  %277 = vperm.xlu0 %1417, %v194_v31  }
  0x71   : >> { %286 = vperm.xlu1 %1418, %v197_v32   ;;  %283 = vperm.xlu0 %1417, %v196_v33  }
  0x75   : >> { %292 = vperm.xlu1 %1418, %v199_v34   ;;  %289 = vperm.xlu0 %1417, %v198_v35  }
  0x79   : >> { %298 = vperm.xlu1 %1418, %v201_v36   ;;  %295 = vperm.xlu0 %1417, %v200_v37  }
  0xbc   : >> { %v206_v40 = vpop.permute.xlu0 %205  ;;  %v212_v42 = vpop.permute.xlu1 %211 }
  0xbd   : >> { %vm300_vm1 = vcmp.eq.s32.totalorder %v1696_v39, %v206_v40  ;;  %vm302_vm2 = vcmp.eq.s32.totalorder %v1696_v39, %v212_v42 }
  0xbe   : >> { %v1248_v41 = vsel %vm300_vm1, 1.0, %v1525_v5  ;;  %v1250_v45 = vsel %vm302_vm2, 1.0, %v1525_v5 }
  0xbf   : >> { %1280 = vmatmul.mubr.msk.f32.vlgmr.msra.gmra.mrb[0].mxu0 %vm396_vm0, %v1248_v41  ;;  %1312 = vmatmul.mubr.msk.f32.vlgmr.msra.gmra.mrb[0].mxu1 %vm396_vm0, %v1248_v41 }
  0xc0   : >> { %v209_v43 = vpop.permute.xlu0 %208  ;;  %563 = vmatprep.mubr.f32.mxu0 %v1525_v5  ;;  %820 = vmatprep.mubr.f32.mxu1 %v1525_v5  ;;  %v215_v46 = vpop.permute.xlu1 %214 }
  0xc1   : >> { %vm301_vm3 = vcmp.eq.s32.totalorder %v1696_v39, %v209_v43  ;;  %vm303_vm4 = vcmp.eq.s32.totalorder %v1696_v39, %v215_v46 }
  0xc2   : >> { %v1249_v44 = vsel %vm301_vm3, 1.0, %v1525_v5  ;;  %v1251_v48 = vsel %vm303_vm4, 1.0, %v1525_v5 }
  0xc3   : >> { %1281 = vmatmul.mubr.msk.f32.gmra.mrb[2].mxu0 %vm396_vm0, %v1249_v44  ;;  %1313 = vmatmul.mubr.msk.f32.gmra.mrb[2].mxu1 %vm396_vm0, %v1249_v44 }
  0xc4   : >> { %569 = vmatprep.mubr.f32.mxu0 %v1525_v5  ;;  %826 = vmatprep.mubr.f32.mxu1 %v1525_v5  ;;  %v218_v47 = vpop.permute.xlu0 %217  ;;  %v221_v49 = vpop.permute.xlu1 %220 }
  0xc5   : >> { %vm304_vm5 = vcmp.eq.s32.totalorder %v1696_v39, %v218_v47  ;;  %vm305_vm6 = vcmp.eq.s32.totalorder %v1696_v39, %v221_v49 }
  0xc6   : >> { %v1252_v50 = vsel %vm304_vm5, 1.0, %v1525_v5  ;;  %v1253_v52 = vsel %vm305_vm6, 1.0, %v1525_v5 }
  0xc7   : >> { %1282 = vmatmul.mubr.msk.f32.gmra.mrb[4].mxu0 %vm396_vm0, %v1250_v45  ;;  %1314 = vmatmul.mubr.msk.f32.gmra.mrb[4].mxu1 %vm396_vm0, %v1250_v45 }
  0xc8   : >> { %575 = vmatprep.mubr.f32.mxu0 %v1525_v5  ;;  %832 = vmatprep.mubr.f32.mxu1 %v1525_v5  ;;  %v224_v51 = vpop.permute.xlu0 %223  ;;  %v227_v53 = vpop.permute.xlu1 %226 }
  0xc9   : >> { %vm306_vm7 = vcmp.eq.s32.totalorder %v1696_v39, %v224_v51  ;;  %vm307_vm8 = vcmp.eq.s32.totalorder %v1696_v39, %v227_v53 }
  0xca   : >> { %v1254_v54 = vsel %vm306_vm7, 1.0, %v1525_v5  ;;  %v1255_v56 = vsel %vm307_vm8, 1.0, %v1525_v5 }
  0xcb   : >> { %1283 = vmatmul.mubr.msk.f32.gmra.mrb[6].mxu0 %vm396_vm0, %v1251_v48  ;;  %1315 = vmatmul.mubr.msk.f32.gmra.mrb[6].mxu1 %vm396_vm0, %v1251_v48 }
  0xcc   : >> { %581 = vmatprep.mubr.f32.mxu0 %v1525_v5  ;;  %838 = vmatprep.mubr.f32.mxu1 %v1525_v5  ;;  %v230_v55 = vpop.permute.xlu0 %229  ;;  %v233_v57 = vpop.permute.xlu1 %232 }
  0xcd   : >> { %vm308_vm9 = vcmp.eq.s32.totalorder %v1696_v39, %v230_v55  ;;  %vm309_vm10 = vcmp.eq.s32.totalorder %v1696_v39, %v233_v57 }
  0xce   : >> { %v1256_v58 = vsel %vm308_vm9, 1.0, %v1525_v5  ;;  %v1257_v60 = vsel %vm309_vm10, 1.0, %v1525_v5 }
  0xcf   : >> { %1284 = vmatmul.mubr.msk.f32.gmra.mrb[8].mxu0 %vm396_vm0, %v1252_v50  ;;  %1316 = vmatmul.mubr.msk.f32.gmra.mrb[8].mxu1 %vm396_vm0, %v1252_v50 }
  0xd0   : >> { %587 = vmatprep.mubr.f32.mxu0 %v1525_v5  ;;  %844 = vmatprep.mubr.f32.mxu1 %v1525_v5  ;;  %v236_v59 = vpop.permute.xlu0 %235  ;;  %v239_v61 = vpop.permute.xlu1 %238 }
  0xd1   : >> { %vm310_vm11 = vcmp.eq.s32.totalorder %v1696_v39, %v236_v59  ;;  %vm311_vm12 = vcmp.eq.s32.totalorder %v1696_v39, %v239_v61 }
  0xd2   : >> { %v1258_v62 = vsel %vm310_vm11, 1.0, %v1525_v5  ;;  %v1259_v4 = vsel %vm311_vm12, 1.0, %v1525_v5 }
  0xd3   : >> { %1285 = vmatmul.mubr.msk.f32.gmra.mrb[10].mxu0 %vm396_vm0, %v1253_v52  ;;  %1317 = vmatmul.mubr.msk.f32.gmra.mrb[10].mxu1 %vm396_vm0, %v1253_v52 }
  0xd4   : >> { %593 = vmatprep.mubr.f32.mxu0 %v1525_v5  ;;  %850 = vmatprep.mubr.f32.mxu1 %v1525_v5  ;;  %v242_v63 = vpop.permute.xlu0 %241  ;;  %v245_v6 = vpop.permute.xlu1 %244 }
  0xd5   : >> { %vm312_vm13 = vcmp.eq.s32.totalorder %v1696_v39, %v242_v63  ;;  %vm313_vm14 = vcmp.eq.s32.totalorder %v1696_v39, %v245_v6 }
  0xd6   : >> { %v1260_v7 = vsel %vm312_vm13, 1.0, %v1525_v5  ;;  %v1261_v9 = vsel %vm313_vm14, 1.0, %v1525_v5 }
  0xd7   : >> { %1286 = vmatmul.mubr.msk.f32.gmra.mrb[12].mxu0 %vm396_vm0, %v1254_v54  ;;  %1318 = vmatmul.mubr.msk.f32.gmra.mrb[12].mxu1 %vm396_vm0, %v1254_v54 }
  0xd8   : >> { %599 = vmatprep.mubr.f32.mxu0 %v1525_v5  ;;  %856 = vmatprep.mubr.f32.mxu1 %v1525_v5  ;;  %v248_v8 = vpop.permute.xlu0 %247  ;;  %v251_v10 = vpop.permute.xlu1 %250 }
  0xd9   : >> { %vm314_vm15 = vcmp.eq.s32.totalorder %v1696_v39, %v248_v8  ;;  %vm315_vm1 = vcmp.eq.s32.totalorder %v1696_v39, %v251_v10 }
  0xda   : >> { %v1262_v11 = vsel %vm314_vm15, 1.0, %v1525_v5  ;;  %v1263_v13 = vsel %vm315_vm1, 1.0, %v1525_v5 }
  0xdb   : >> { %1287 = vmatmul.mubr.msk.f32.gmra.mrb[14].mxu0 %vm396_vm0, %v1255_v56  ;;  %1319 = vmatmul.mubr.msk.f32.gmra.mrb[14].mxu1 %vm396_vm0, %v1255_v56 }
  0xdc   : >> { %605 = vmatprep.mubr.f32.mxu0 %v1525_v5  ;;  %862 = vmatprep.mubr.f32.mxu1 %v1525_v5  ;;  %v254_v12 = vpop.permute.xlu0 %253  ;;  %v257_v14 = vpop.permute.xlu1 %256 }
  0xdd   : >> { %vm316_vm2 = vcmp.eq.s32.totalorder %v1696_v39, %v254_v12  ;;  %vm317_vm3 = vcmp.eq.s32.totalorder %v1696_v39, %v257_v14 }
  0xde   : >> { %v1264_v15 = vsel %vm316_vm2, 1.0, %v1525_v5  ;;  %v1265_v17 = vsel %vm317_vm3, 1.0, %v1525_v5 }
  0xdf   : >> { %1288 = vmatmul.mubr.msk.f32.gmra.mrb[16].mxu0 %vm396_vm0, %v1256_v58  ;;  %1320 = vmatmul.mubr.msk.f32.gmra.mrb[16].mxu1 %vm396_vm0, %v1256_v58 }
  0xe0   : >> { %611 = vmatprep.mubr.f32.mxu0 %v1525_v5  ;;  %868 = vmatprep.mubr.f32.mxu1 %v1525_v5  ;;  %v260_v16 = vpop.permute.xlu0 %259  ;;  %v263_v18 = vpop.permute.xlu1 %262 }
  0xe1   : >> { %vm318_vm4 = vcmp.eq.s32.totalorder %v1696_v39, %v260_v16  ;;  %vm319_vm5 = vcmp.eq.s32.totalorder %v1696_v39, %v263_v18 }
  0xe2   : >> { %v1266_v19 = vsel %vm318_vm4, 1.0, %v1525_v5  ;;  %v1267_v21 = vsel %vm319_vm5, 1.0, %v1525_v5 }
  0xe3   : >> { %1289 = vmatmul.mubr.msk.f32.gmra.mrb[18].mxu0 %vm396_vm0, %v1257_v60  ;;  %1321 = vmatmul.mubr.msk.f32.gmra.mrb[18].mxu1 %vm396_vm0, %v1257_v60 }
  0xe4   : >> { %617 = vmatprep.mubr.f32.mxu0 %v1525_v5  ;;  %874 = vmatprep.mubr.f32.mxu1 %v1525_v5  ;;  %v266_v20 = vpop.permute.xlu0 %265  ;;  %v269_v22 = vpop.permute.xlu1 %268 }
  0xe5   : >> { %vm320_vm6 = vcmp.eq.s32.totalorder %v1696_v39, %v266_v20  ;;  %vm321_vm7 = vcmp.eq.s32.totalorder %v1696_v39, %v269_v22 }
  0xe6   : >> { %v1268_v23 = vsel %vm320_vm6, 1.0, %v1525_v5  ;;  %v1269_v25 = vsel %vm321_vm7, 1.0, %v1525_v5 }
  0xe7   : >> { %1290 = vmatmul.mubr.msk.f32.gmra.mrb[20].mxu0 %vm396_vm0, %v1258_v62  ;;  %1322 = vmatmul.mubr.msk.f32.gmra.mrb[20].mxu1 %vm396_vm0, %v1258_v62 }
  0xe8   : >> { %623 = vmatprep.mubr.f32.mxu0 %v1525_v5  ;;  %880 = vmatprep.mubr.f32.mxu1 %v1525_v5  ;;  %v272_v24 = vpop.permute.xlu0 %271  ;;  %v275_v26 = vpop.permute.xlu1 %274 }
  0xe9   : >> { %vm322_vm8 = vcmp.eq.s32.totalorder %v1696_v39, %v272_v24  ;;  %vm323_vm9 = vcmp.eq.s32.totalorder %v1696_v39, %v275_v26 }
  0xea   : >> { %v1270_v27 = vsel %vm322_vm8, 1.0, %v1525_v5  ;;  %v1271_v29 = vsel %vm323_vm9, 1.0, %v1525_v5 }
  0xeb   : >> { %1291 = vmatmul.mubr.msk.f32.gmra.mrb[22].mxu0 %vm396_vm0, %v1259_v4  ;;  %1323 = vmatmul.mubr.msk.f32.gmra.mrb[22].mxu1 %vm396_vm0, %v1259_v4 }
  0xec   : >> { %629 = vmatprep.mubr.f32.mxu0 %v1525_v5  ;;  %886 = vmatprep.mubr.f32.mxu1 %v1525_v5  ;;  %v278_v28 = vpop.permute.xlu0 %277  ;;  %v281_v30 = vpop.permute.xlu1 %280 }
  0xed   : >> { %vm324_vm10 = vcmp.eq.s32.totalorder %v1696_v39, %v278_v28  ;;  %vm325_vm11 = vcmp.eq.s32.totalorder %v1696_v39, %v281_v30 }
  0xee   : >> { %v1272_v31 = vsel %vm324_vm10, 1.0, %v1525_v5  ;;  %v1273_v33 = vsel %vm325_vm11, 1.0, %v1525_v5 }
  0xef   : >> { %1292 = vmatmul.mubr.msk.f32.gmra.mrb[24].mxu0 %vm396_vm0, %v1260_v7  ;;  %1324 = vmatmul.mubr.msk.f32.gmra.mrb[24].mxu1 %vm396_vm0, %v1260_v7 }
  0xf0   : >> { %635 = vmatprep.mubr.f32.mxu0 %v1525_v5  ;;  %892 = vmatprep.mubr.f32.mxu1 %v1525_v5  ;;  %v284_v32 = vpop.permute.xlu0 %283  ;;  %v287_v34 = vpop.permute.xlu1 %286 }
  0xf1   : >> { %vm326_vm12 = vcmp.eq.s32.totalorder %v1696_v39, %v284_v32  ;;  %vm327_vm13 = vcmp.eq.s32.totalorder %v1696_v39, %v287_v34 }
  0xf2   : >> { %v1274_v35 = vsel %vm326_vm12, 1.0, %v1525_v5  ;;  %v1275_v37 = vsel %vm327_vm13, 1.0, %v1525_v5 }
  0xf3   : >> { %1293 = vmatmul.mubr.msk.f32.gmra.mrb[26].mxu0 %vm396_vm0, %v1261_v9  ;;  %1325 = vmatmul.mubr.msk.f32.gmra.mrb[26].mxu1 %vm396_vm0, %v1261_v9 }
  0xf4   : >> { %641 = vmatprep.mubr.f32.mxu0 %v1525_v5  ;;  %898 = vmatprep.mubr.f32.mxu1 %v1525_v5  ;;  %v290_v36 = vpop.permute.xlu0 %289  ;;  %v293_v38 = vpop.permute.xlu1 %292 }
  0xf5   : >> { %vm328_vm14 = vcmp.eq.s32.totalorder %v1696_v39, %v290_v36  ;;  %vm329_vm15 = vcmp.eq.s32.totalorder %v1696_v39, %v293_v38 }
  0xf6   : >> { %v1276_v40 = vsel %vm328_vm14, 1.0, %v1525_v5  ;;  %v1277_v42 = vsel %vm329_vm15, 1.0, %v1525_v5 }
  0xf7   : >> { %1294 = vmatmul.mubr.msk.f32.gmra.mrb[28].mxu0 %vm396_vm0, %v1262_v11  ;;  %1326 = vmatmul.mubr.msk.f32.gmra.mrb[28].mxu1 %vm396_vm0, %v1262_v11 }
  0xf8   : >> { %647 = vmatprep.mubr.f32.mxu0 %v1525_v5  ;;  %904 = vmatprep.mubr.f32.mxu1 %v1525_v5  ;;  %v296_v41 = vpop.permute.xlu0 %295  ;;  %v299_v43 = vpop.permute.xlu1 %298 }
  0xf9   : >> { %vm330_vm1 = vcmp.eq.s32.totalorder %v1696_v39, %v296_v41  ;;  %vm331_vm2 = vcmp.eq.s32.totalorder %v1696_v39, %v299_v43 }
  0xfa   : >> { %v1278_v44 = vsel %vm330_vm1, 1.0, %v1525_v5  ;;  %v1279_v45 = vsel %vm331_vm2, 1.0, %v1525_v5 }
  0xfb   : >> { %1295 = vmatmul.mubr.msk.f32.gmra.mrb[30].mxu0 %vm396_vm0, %v1263_v13  ;;  %1327 = vmatmul.mubr.msk.f32.gmra.mrb[30].mxu1 %vm396_vm0, %v1263_v13 }
  0xfc   : >> { %653 = vmatprep.mubr.f32.mxu0 %v1525_v5  ;;  %910 = vmatprep.mubr.f32.mxu1 %v1525_v5 }
  0xff   : >> { %1296 = vmatmul.mubr.msk.f32.gmra.mrb[32].mxu0 %vm396_vm0, %v1264_v15  ;;  %1328 = vmatmul.mubr.msk.f32.gmra.mrb[32].mxu1 %vm396_vm0, %v1264_v15 }
 0x100   : >> { %659 = vmatprep.mubr.f32.mxu0 %v1525_v5  ;;  %916 = vmatprep.mubr.f32.mxu1 %v1525_v5 }
 0x103   : >> { %1297 = vmatmul.mubr.msk.f32.gmra.mrb[34].mxu0 %vm396_vm0, %v1265_v17  ;;  %1329 = vmatmul.mubr.msk.f32.gmra.mrb[34].mxu1 %vm396_vm0, %v1265_v17 }
 0x104   : >> { %665 = vmatprep.mubr.f32.mxu0 %v1525_v5  ;;  %922 = vmatprep.mubr.f32.mxu1 %v1525_v5 }
 0x107   : >> { %1298 = vmatmul.mubr.msk.f32.gmra.mrb[36].mxu0 %vm396_vm0, %v1266_v19  ;;  %1330 = vmatmul.mubr.msk.f32.gmra.mrb[36].mxu1 %vm396_vm0, %v1266_v19 }
 0x108   : >> { %671 = vmatprep.mubr.f32.mxu0 %v1525_v5  ;;  %928 = vmatprep.mubr.f32.mxu1 %v1525_v5 }
 0x10b   : >> { %1299 = vmatmul.mubr.msk.f32.gmra.mrb[38].mxu0 %vm396_vm0, %v1267_v21  ;;  %1331 = vmatmul.mubr.msk.f32.gmra.mrb[38].mxu1 %vm396_vm0, %v1267_v21 }
 0x10c   : >> { %677 = vmatprep.mubr.f32.mxu0 %v1525_v5  ;;  %934 = vmatprep.mubr.f32.mxu1 %v1525_v5 }
 0x10f   : >> { %1300 = vmatmul.mubr.msk.f32.gmra.mrb[40].mxu0 %vm396_vm0, %v1268_v23  ;;  %1332 = vmatmul.mubr.msk.f32.gmra.mrb[40].mxu1 %vm396_vm0, %v1268_v23 }
 0x110   : >> { %683 = vmatprep.mubr.f32.mxu0 %v1525_v5  ;;  %940 = vmatprep.mubr.f32.mxu1 %v1525_v5 }
 0x113   : >> { %1301 = vmatmul.mubr.msk.f32.gmra.mrb[42].mxu0 %vm396_vm0, %v1269_v25  ;;  %1333 = vmatmul.mubr.msk.f32.gmra.mrb[42].mxu1 %vm396_vm0, %v1269_v25 }
 0x114   : >> { %689 = vmatprep.mubr.f32.mxu0 %v1525_v5  ;;  %946 = vmatprep.mubr.f32.mxu1 %v1525_v5 }
 0x117   : >> { %1302 = vmatmul.mubr.msk.f32.gmra.mrb[44].mxu0 %vm396_vm0, %v1270_v27  ;;  %1334 = vmatmul.mubr.msk.f32.gmra.mrb[44].mxu1 %vm396_vm0, %v1270_v27 }
 0x118   : >> { %695 = vmatprep.mubr.f32.mxu0 %v1525_v5  ;;  %952 = vmatprep.mubr.f32.mxu1 %v1525_v5 }
 0x11b   : >> { %1303 = vmatmul.mubr.msk.f32.gmra.mrb[46].mxu0 %vm396_vm0, %v1271_v29  ;;  %1335 = vmatmul.mubr.msk.f32.gmra.mrb[46].mxu1 %vm396_vm0, %v1271_v29 }
 0x11c   : >> { %701 = vmatprep.mubr.f32.mxu0 %v1525_v5  ;;  %958 = vmatprep.mubr.f32.mxu1 %v1525_v5 }
 0x11f   : >> { %1304 = vmatmul.mubr.msk.f32.gmra.mrb[48].mxu0 %vm396_vm0, %v1272_v31  ;;  %1336 = vmatmul.mubr.msk.f32.gmra.mrb[48].mxu1 %vm396_vm0, %v1272_v31 }
 0x120   : >> { %707 = vmatprep.mubr.f32.mxu0 %v1525_v5  ;;  %964 = vmatprep.mubr.f32.mxu1 %v1525_v5 }
 0x123   : >> { %1305 = vmatmul.mubr.msk.f32.gmra.mrb[50].mxu0 %vm396_vm0, %v1273_v33  ;;  %1337 = vmatmul.mubr.msk.f32.gmra.mrb[50].mxu1 %vm396_vm0, %v1273_v33 }
 0x124   : >> { %713 = vmatprep.mubr.f32.mxu0 %v1525_v5  ;;  %970 = vmatprep.mubr.f32.mxu1 %v1525_v5 }
 0x127   : >> { %1306 = vmatmul.mubr.msk.f32.gmra.mrb[52].mxu0 %vm396_vm0, %v1274_v35  ;;  %1338 = vmatmul.mubr.msk.f32.gmra.mrb[52].mxu1 %vm396_vm0, %v1274_v35 }
 0x128   : >> { %719 = vmatprep.mubr.f32.mxu0 %v1525_v5  ;;  %976 = vmatprep.mubr.f32.mxu1 %v1525_v5 }
 0x12b   : >> { %1307 = vmatmul.mubr.msk.f32.gmra.mrb[54].mxu0 %vm396_vm0, %v1275_v37  ;;  %1339 = vmatmul.mubr.msk.f32.gmra.mrb[54].mxu1 %vm396_vm0, %v1275_v37 }
 0x12c   : >> { %725 = vmatprep.mubr.f32.mxu0 %v1525_v5  ;;  %982 = vmatprep.mubr.f32.mxu1 %v1525_v5 }
 0x12f   : >> { %1308 = vmatmul.mubr.msk.f32.gmra.mrb[56].mxu0 %vm396_vm0, %v1276_v40  ;;  %1340 = vmatmul.mubr.msk.f32.gmra.mrb[56].mxu1 %vm396_vm0, %v1276_v40 }
 0x130   : >> { %731 = vmatprep.mubr.f32.mxu0 %v1525_v5  ;;  %988 = vmatprep.mubr.f32.mxu1 %v1525_v5 }
 0x133   : >> { %1309 = vmatmul.mubr.msk.f32.gmra.mrb[58].mxu0 %vm396_vm0, %v1277_v42  ;;  %1341 = vmatmul.mubr.msk.f32.gmra.mrb[58].mxu1 %vm396_vm0, %v1277_v42 }
 0x134   : >> { %737 = vmatprep.mubr.f32.mxu0 %v1525_v5  ;;  %994 = vmatprep.mubr.f32.mxu1 %v1525_v5 }
 0x137   : >> { %1310 = vmatmul.mubr.msk.f32.gmra.mrb[60].mxu0 %vm396_vm0, %v1278_v44  ;;  %1342 = vmatmul.mubr.msk.f32.gmra.mrb[60].mxu1 %vm396_vm0, %v1278_v44 }
 0x138   : >> { %743 = vmatprep.mubr.f32.mxu0 %v1525_v5  ;;  %1000 = vmatprep.mubr.f32.mxu1 %v1525_v5 }
 0x13b   : >> { %1311 = vmatmul.mubr.msk.f32.gmra.mrb[62].mxu0 %vm396_vm0, %v1279_v45  ;;  %1343 = vmatmul.mubr.msk.f32.gmra.mrb[62].mxu1 %vm396_vm0, %v1279_v45 }
 0x192   : >> { %v559_v39 = vpop.f32.mrb[0].mxu0  ;;  %v816_v5 = vpop.f32.mrb[0].mxu1 }
 0x193   : >> { %1012 = vst [vmem:[%s1892_s29] sm:$0xff] %v559_v39  ;;  %1014 = vst [vmem:[%s1892_s29 + $0x10] sm:$0xff] %v816_v5  ;;  %v561_v46 = vpop.f32.mrb[1].mxu0  ;;  %v818_v47 = vpop.f32.mrb[1].mxu1 }
 0x194   : >> { %1013 = vst [vmem:[%s1892_s29 + $0x8] sm:$0xff] %v561_v46  ;;  %1015 = vst [vmem:[%s1892_s29 + $0x18] sm:$0xff] %v818_v47 }
 0x196   : >> { %v565_v48 = vpop.f32.mrb[2].mxu0  ;;  %v822_v49 = vpop.f32.mrb[2].mxu1 }
 0x197   : >> { %1016 = vst [vmem:[%s1892_s29 + $0x20] sm:$0xff] %v565_v48  ;;  %1018 = vst [vmem:[%s1892_s29 + $0x30] sm:$0xff] %v822_v49  ;;  %v567_v50 = vpop.f32.mrb[3].mxu0  ;;  %v824_v51 = vpop.f32.mrb[3].mxu1 }
 0x198   : >> { %1017 = vst [vmem:[%s1892_s29 + $0x28] sm:$0xff] %v567_v50  ;;  %1019 = vst [vmem:[%s1892_s29 + $0x38] sm:$0xff] %v824_v51 }
 0x19a   : >> { %v571_v52 = vpop.f32.mrb[4].mxu0  ;;  %v828_v53 = vpop.f32.mrb[4].mxu1 }
 0x19b   : >> { %1020 = vst [vmem:[%s1892_s29 + $0x40] sm:$0xff] %v571_v52  ;;  %1022 = vst [vmem:[%s1892_s29 + $0x50] sm:$0xff] %v828_v53  ;;  %v573_v54 = vpop.f32.mrb[5].mxu0  ;;  %v830_v55 = vpop.f32.mrb[5].mxu1 }
 0x19c   : >> { %1021 = vst [vmem:[%s1892_s29 + $0x48] sm:$0xff] %v573_v54  ;;  %1023 = vst [vmem:[%s1892_s29 + $0x58] sm:$0xff] %v830_v55 }
 0x19e   : >> { %v577_v56 = vpop.f32.mrb[6].mxu0  ;;  %v834_v57 = vpop.f32.mrb[6].mxu1 }
 0x19f   : >> { %1024 = vst [vmem:[%s1892_s29 + $0x60] sm:$0xff] %v577_v56  ;;  %1026 = vst [vmem:[%s1892_s29 + $0x70] sm:$0xff] %v834_v57  ;;  %v579_v58 = vpop.f32.mrb[7].mxu0  ;;  %v836_v59 = vpop.f32.mrb[7].mxu1 }
 0x1a0   : >> { %1025 = vst [vmem:[%s1892_s29 + $0x68] sm:$0xff] %v579_v58  ;;  %1027 = vst [vmem:[%s1892_s29 + $0x78] sm:$0xff] %v836_v59 }
 0x1a2   : >> { %v583_v60 = vpop.f32.mrb[8].mxu0  ;;  %v840_v61 = vpop.f32.mrb[8].mxu1 }
 0x1a3   : >> { %1028 = vst [vmem:[%s1892_s29 + $0x80] sm:$0xff] %v583_v60  ;;  %1030 = vst [vmem:[%s1892_s29 + $0x90] sm:$0xff] %v840_v61  ;;  %v585_v62 = vpop.f32.mrb[9].mxu0  ;;  %v842_v63 = vpop.f32.mrb[9].mxu1 }
 0x1a4   : >> { %1029 = vst [vmem:[%s1892_s29 + $0x88] sm:$0xff] %v585_v62  ;;  %1031 = vst [vmem:[%s1892_s29 + $0x98] sm:$0xff] %v842_v63 }
 0x1a6   : >> { %v589_v4 = vpop.f32.mrb[10].mxu0  ;;  %v846_v6 = vpop.f32.mrb[10].mxu1 }
 0x1a7   : >> { %1032 = vst [vmem:[%s1892_s29 + $0xa0] sm:$0xff] %v589_v4  ;;  %1034 = vst [vmem:[%s1892_s29 + $0xb0] sm:$0xff] %v846_v6  ;;  %v591_v7 = vpop.f32.mrb[11].mxu0  ;;  %v848_v8 = vpop.f32.mrb[11].mxu1 }
 0x1a8   : >> { %1033 = vst [vmem:[%s1892_s29 + $0xa8] sm:$0xff] %v591_v7  ;;  %1035 = vst [vmem:[%s1892_s29 + $0xb8] sm:$0xff] %v848_v8 }
 0x1aa   : >> { %v595_v9 = vpop.f32.mrb[12].mxu0  ;;  %v852_v10 = vpop.f32.mrb[12].mxu1 }
 0x1ab   : >> { %1036 = vst [vmem:[%s1892_s29 + $0xc0] sm:$0xff] %v595_v9  ;;  %1038 = vst [vmem:[%s1892_s29 + $0xd0] sm:$0xff] %v852_v10  ;;  %v597_v11 = vpop.f32.mrb[13].mxu0  ;;  %v854_v12 = vpop.f32.mrb[13].mxu1 }
 0x1ac   : >> { %1037 = vst [vmem:[%s1892_s29 + $0xc8] sm:$0xff] %v597_v11  ;;  %1039 = vst [vmem:[%s1892_s29 + $0xd8] sm:$0xff] %v854_v12 }
 0x1ae   : >> { %v601_v13 = vpop.f32.mrb[14].mxu0  ;;  %v858_v14 = vpop.f32.mrb[14].mxu1 }
 0x1af   : >> { %1040 = vst [vmem:[%s1892_s29 + $0xe0] sm:$0xff] %v601_v13  ;;  %1042 = vst [vmem:[%s1892_s29 + $0xf0] sm:$0xff] %v858_v14  ;;  %v603_v15 = vpop.f32.mrb[15].mxu0  ;;  %v860_v16 = vpop.f32.mrb[15].mxu1 }
 0x1b0   : >> { %1041 = vst [vmem:[%s1892_s29 + $0xe8] sm:$0xff] %v603_v15  ;;  %1043 = vst [vmem:[%s1892_s29 + $0xf8] sm:$0xff] %v860_v16 }
 0x1b2   : >> { %v607_v17 = vpop.f32.mrb[16].mxu0  ;;  %v864_v18 = vpop.f32.mrb[16].mxu1 }
 0x1b3   : >> { %1044 = vst [vmem:[%s1892_s29 + $0x100] sm:$0xff] %v607_v17  ;;  %1046 = vst [vmem:[%s1892_s29 + $0x110] sm:$0xff] %v864_v18  ;;  %v609_v19 = vpop.f32.mrb[17].mxu0  ;;  %v866_v20 = vpop.f32.mrb[17].mxu1 }
 0x1b4   : >> { %1045 = vst [vmem:[%s1892_s29 + $0x108] sm:$0xff] %v609_v19  ;;  %1047 = vst [vmem:[%s1892_s29 + $0x118] sm:$0xff] %v866_v20 }
 0x1b6   : >> { %v613_v21 = vpop.f32.mrb[18].mxu0  ;;  %v870_v22 = vpop.f32.mrb[18].mxu1 }
 0x1b7   : >> { %1048 = vst [vmem:[%s1892_s29 + $0x120] sm:$0xff] %v613_v21  ;;  %1050 = vst [vmem:[%s1892_s29 + $0x130] sm:$0xff] %v870_v22  ;;  %v615_v23 = vpop.f32.mrb[19].mxu0  ;;  %v872_v24 = vpop.f32.mrb[19].mxu1 }
 0x1b8   : >> { %1049 = vst [vmem:[%s1892_s29 + $0x128] sm:$0xff] %v615_v23  ;;  %1051 = vst [vmem:[%s1892_s29 + $0x138] sm:$0xff] %v872_v24 }
 0x1ba   : >> { %v619_v25 = vpop.f32.mrb[20].mxu0  ;;  %v876_v26 = vpop.f32.mrb[20].mxu1 }
 0x1bb   : >> { %1052 = vst [vmem:[%s1892_s29 + $0x140] sm:$0xff] %v619_v25  ;;  %1054 = vst [vmem:[%s1892_s29 + $0x150] sm:$0xff] %v876_v26  ;;  %v621_v27 = vpop.f32.mrb[21].mxu0  ;;  %v878_v28 = vpop.f32.mrb[21].mxu1 }
 0x1bc   : >> { %1053 = vst [vmem:[%s1892_s29 + $0x148] sm:$0xff] %v621_v27  ;;  %1055 = vst [vmem:[%s1892_s29 + $0x158] sm:$0xff] %v878_v28 }
 0x1be   : >> { %v625_v29 = vpop.f32.mrb[22].mxu0  ;;  %v882_v30 = vpop.f32.mrb[22].mxu1 }
 0x1bf   : >> { %1056 = vst [vmem:[%s1892_s29 + $0x160] sm:$0xff] %v625_v29  ;;  %1058 = vst [vmem:[%s1892_s29 + $0x170] sm:$0xff] %v882_v30  ;;  %v627_v31 = vpop.f32.mrb[23].mxu0  ;;  %v884_v32 = vpop.f32.mrb[23].mxu1 }
 0x1c0   : >> { %1057 = vst [vmem:[%s1892_s29 + $0x168] sm:$0xff] %v627_v31  ;;  %1059 = vst [vmem:[%s1892_s29 + $0x178] sm:$0xff] %v884_v32 }
 0x1c2   : >> { %v631_v33 = vpop.f32.mrb[24].mxu0  ;;  %v888_v34 = vpop.f32.mrb[24].mxu1 }
 0x1c3   : >> { %1060 = vst [vmem:[%s1892_s29 + $0x180] sm:$0xff] %v631_v33  ;;  %1062 = vst [vmem:[%s1892_s29 + $0x190] sm:$0xff] %v888_v34  ;;  %v633_v35 = vpop.f32.mrb[25].mxu0  ;;  %v890_v36 = vpop.f32.mrb[25].mxu1 }
 0x1c4   : >> { %1061 = vst [vmem:[%s1892_s29 + $0x188] sm:$0xff] %v633_v35  ;;  %1063 = vst [vmem:[%s1892_s29 + $0x198] sm:$0xff] %v890_v36 }
 0x1c6   : >> { %v637_v37 = vpop.f32.mrb[26].mxu0  ;;  %v894_v38 = vpop.f32.mrb[26].mxu1 }
 0x1c7   : >> { %1064 = vst [vmem:[%s1892_s29 + $0x1a0] sm:$0xff] %v637_v37  ;;  %1066 = vst [vmem:[%s1892_s29 + $0x1b0] sm:$0xff] %v894_v38  ;;  %v639_v40 = vpop.f32.mrb[27].mxu0  ;;  %v896_v41 = vpop.f32.mrb[27].mxu1 }
 0x1c8   : >> { %1065 = vst [vmem:[%s1892_s29 + $0x1a8] sm:$0xff] %v639_v40  ;;  %1067 = vst [vmem:[%s1892_s29 + $0x1b8] sm:$0xff] %v896_v41 }
 0x1ca   : >> { %v643_v42 = vpop.f32.mrb[28].mxu0  ;;  %v900_v43 = vpop.f32.mrb[28].mxu1 }
 0x1cb   : >> { %1068 = vst [vmem:[%s1892_s29 + $0x1c0] sm:$0xff] %v643_v42  ;;  %1070 = vst [vmem:[%s1892_s29 + $0x1d0] sm:$0xff] %v900_v43  ;;  %v645_v44 = vpop.f32.mrb[29].mxu0  ;;  %v902_v45 = vpop.f32.mrb[29].mxu1 }
 0x1cc   : >> { %1069 = vst [vmem:[%s1892_s29 + $0x1c8] sm:$0xff] %v645_v44  ;;  %1071 = vst [vmem:[%s1892_s29 + $0x1d8] sm:$0xff] %v902_v45 }
 0x1ce   : >> { %v649_v39 = vpop.f32.mrb[30].mxu0  ;;  %v906_v5 = vpop.f32.mrb[30].mxu1 }
 0x1cf   : >> { %1072 = vst [vmem:[%s1892_s29 + $0x1e0] sm:$0xff] %v649_v39  ;;  %1074 = vst [vmem:[%s1892_s29 + $0x1f0] sm:$0xff] %v906_v5  ;;  %v651_v46 = vpop.f32.mrb[31].mxu0  ;;  %v908_v47 = vpop.f32.mrb[31].mxu1 }
 0x1d0   : >> { %1073 = vst [vmem:[%s1892_s29 + $0x1e8] sm:$0xff] %v651_v46  ;;  %1075 = vst [vmem:[%s1892_s29 + $0x1f8] sm:$0xff] %v908_v47 }
 0x1d2   : >> { %v655_v48 = vpop.f32.mrb[32].mxu0  ;;  %v912_v49 = vpop.f32.mrb[32].mxu1 }
 0x1d3   : >> { %1076 = vst [vmem:[%s1892_s29 + $0x200] sm:$0xff] %v655_v48  ;;  %1078 = vst [vmem:[%s1892_s29 + $0x210] sm:$0xff] %v912_v49  ;;  %v657_v50 = vpop.f32.mrb[33].mxu0  ;;  %v914_v51 = vpop.f32.mrb[33].mxu1 }
 0x1d4   : >> { %1077 = vst [vmem:[%s1892_s29 + $0x208] sm:$0xff] %v657_v50  ;;  %1079 = vst [vmem:[%s1892_s29 + $0x218] sm:$0xff] %v914_v51 }
 0x1d6   : >> { %v661_v52 = vpop.f32.mrb[34].mxu0  ;;  %v918_v53 = vpop.f32.mrb[34].mxu1 }
 0x1d7   : >> { %1080 = vst [vmem:[%s1892_s29 + $0x220] sm:$0xff] %v661_v52  ;;  %1082 = vst [vmem:[%s1892_s29 + $0x230] sm:$0xff] %v918_v53  ;;  %v663_v54 = vpop.f32.mrb[35].mxu0  ;;  %v920_v55 = vpop.f32.mrb[35].mxu1 }
 0x1d8   : >> { %1081 = vst [vmem:[%s1892_s29 + $0x228] sm:$0xff] %v663_v54  ;;  %1083 = vst [vmem:[%s1892_s29 + $0x238] sm:$0xff] %v920_v55 }
 0x1da   : >> { %v667_v56 = vpop.f32.mrb[36].mxu0  ;;  %v924_v57 = vpop.f32.mrb[36].mxu1 }
 0x1db   : >> { %1084 = vst [vmem:[%s1892_s29 + $0x240] sm:$0xff] %v667_v56  ;;  %1086 = vst [vmem:[%s1892_s29 + $0x250] sm:$0xff] %v924_v57  ;;  %v669_v58 = vpop.f32.mrb[37].mxu0  ;;  %v926_v59 = vpop.f32.mrb[37].mxu1 }
 0x1dc   : >> { %1085 = vst [vmem:[%s1892_s29 + $0x248] sm:$0xff] %v669_v58  ;;  %1087 = vst [vmem:[%s1892_s29 + $0x258] sm:$0xff] %v926_v59 }
 0x1de   : >> { %v673_v60 = vpop.f32.mrb[38].mxu0  ;;  %v930_v61 = vpop.f32.mrb[38].mxu1 }
 0x1df   : >> { %1088 = vst [vmem:[%s1892_s29 + $0x260] sm:$0xff] %v673_v60  ;;  %1090 = vst [vmem:[%s1892_s29 + $0x270] sm:$0xff] %v930_v61  ;;  %v675_v62 = vpop.f32.mrb[39].mxu0  ;;  %v932_v63 = vpop.f32.mrb[39].mxu1 }
 0x1e0   : >> { %1089 = vst [vmem:[%s1892_s29 + $0x268] sm:$0xff] %v675_v62  ;;  %1091 = vst [vmem:[%s1892_s29 + $0x278] sm:$0xff] %v932_v63 }
 0x1e2   : >> { %v679_v4 = vpop.f32.mrb[40].mxu0  ;;  %v936_v6 = vpop.f32.mrb[40].mxu1 }
 0x1e3   : >> { %1092 = vst [vmem:[%s1892_s29 + $0x280] sm:$0xff] %v679_v4  ;;  %1094 = vst [vmem:[%s1892_s29 + $0x290] sm:$0xff] %v936_v6  ;;  %v681_v7 = vpop.f32.mrb[41].mxu0  ;;  %v938_v8 = vpop.f32.mrb[41].mxu1 }
 0x1e4   : >> { %1093 = vst [vmem:[%s1892_s29 + $0x288] sm:$0xff] %v681_v7  ;;  %1095 = vst [vmem:[%s1892_s29 + $0x298] sm:$0xff] %v938_v8 }
 0x1e6   : >> { %v685_v9 = vpop.f32.mrb[42].mxu0  ;;  %v942_v10 = vpop.f32.mrb[42].mxu1 }
 0x1e7   : >> { %1096 = vst [vmem:[%s1892_s29 + $0x2a0] sm:$0xff] %v685_v9  ;;  %1098 = vst [vmem:[%s1892_s29 + $0x2b0] sm:$0xff] %v942_v10  ;;  %v687_v11 = vpop.f32.mrb[43].mxu0  ;;  %v944_v12 = vpop.f32.mrb[43].mxu1 }
 0x1e8   : >> { %1097 = vst [vmem:[%s1892_s29 + $0x2a8] sm:$0xff] %v687_v11  ;;  %1099 = vst [vmem:[%s1892_s29 + $0x2b8] sm:$0xff] %v944_v12 }
 0x1ea   : >> { %v691_v13 = vpop.f32.mrb[44].mxu0  ;;  %v948_v14 = vpop.f32.mrb[44].mxu1 }
 0x1eb   : >> { %1100 = vst [vmem:[%s1892_s29 + $0x2c0] sm:$0xff] %v691_v13  ;;  %1102 = vst [vmem:[%s1892_s29 + $0x2d0] sm:$0xff] %v948_v14  ;;  %v693_v15 = vpop.f32.mrb[45].mxu0  ;;  %v950_v16 = vpop.f32.mrb[45].mxu1 }
 0x1ec   : >> { %1101 = vst [vmem:[%s1892_s29 + $0x2c8] sm:$0xff] %v693_v15  ;;  %1103 = vst [vmem:[%s1892_s29 + $0x2d8] sm:$0xff] %v950_v16 }
 0x1ee   : >> { %v697_v17 = vpop.f32.mrb[46].mxu0  ;;  %v954_v18 = vpop.f32.mrb[46].mxu1 }
 0x1ef   : >> { %1104 = vst [vmem:[%s1892_s29 + $0x2e0] sm:$0xff] %v697_v17  ;;  %1106 = vst [vmem:[%s1892_s29 + $0x2f0] sm:$0xff] %v954_v18  ;;  %v699_v19 = vpop.f32.mrb[47].mxu0  ;;  %v956_v20 = vpop.f32.mrb[47].mxu1 }
 0x1f0   : >> { %1105 = vst [vmem:[%s1892_s29 + $0x2e8] sm:$0xff] %v699_v19  ;;  %1107 = vst [vmem:[%s1892_s29 + $0x2f8] sm:$0xff] %v956_v20 }
 0x1f2   : >> { %v703_v21 = vpop.f32.mrb[48].mxu0  ;;  %v960_v22 = vpop.f32.mrb[48].mxu1 }
 0x1f3   : >> { %1108 = vst [vmem:[%s1892_s29 + $0x300] sm:$0xff] %v703_v21  ;;  %1110 = vst [vmem:[%s1892_s29 + $0x310] sm:$0xff] %v960_v22  ;;  %v705_v23 = vpop.f32.mrb[49].mxu0  ;;  %v962_v24 = vpop.f32.mrb[49].mxu1 }
 0x1f4   : >> { %1109 = vst [vmem:[%s1892_s29 + $0x308] sm:$0xff] %v705_v23  ;;  %1111 = vst [vmem:[%s1892_s29 + $0x318] sm:$0xff] %v962_v24 }
 0x1f6   : >> { %v709_v25 = vpop.f32.mrb[50].mxu0  ;;  %v966_v26 = vpop.f32.mrb[50].mxu1 }
 0x1f7   : >> { %1112 = vst [vmem:[%s1892_s29 + $0x320] sm:$0xff] %v709_v25  ;;  %1114 = vst [vmem:[%s1892_s29 + $0x330] sm:$0xff] %v966_v26  ;;  %v711_v27 = vpop.f32.mrb[51].mxu0  ;;  %v968_v28 = vpop.f32.mrb[51].mxu1 }
 0x1f8   : >> { %1113 = vst [vmem:[%s1892_s29 + $0x328] sm:$0xff] %v711_v27  ;;  %1115 = vst [vmem:[%s1892_s29 + $0x338] sm:$0xff] %v968_v28 }
 0x1fa   : >> { %v715_v29 = vpop.f32.mrb[52].mxu0  ;;  %v972_v30 = vpop.f32.mrb[52].mxu1 }
 0x1fb   : >> { %1116 = vst [vmem:[%s1892_s29 + $0x340] sm:$0xff] %v715_v29  ;;  %1118 = vst [vmem:[%s1892_s29 + $0x350] sm:$0xff] %v972_v30  ;;  %v717_v31 = vpop.f32.mrb[53].mxu0  ;;  %v974_v32 = vpop.f32.mrb[53].mxu1 }
 0x1fc   : >> { %1117 = vst [vmem:[%s1892_s29 + $0x348] sm:$0xff] %v717_v31  ;;  %1119 = vst [vmem:[%s1892_s29 + $0x358] sm:$0xff] %v974_v32 }
 0x1fe   : >> { %v721_v33 = vpop.f32.mrb[54].mxu0  ;;  %v978_v34 = vpop.f32.mrb[54].mxu1 }
 0x1ff   : >> { %1120 = vst [vmem:[%s1892_s29 + $0x360] sm:$0xff] %v721_v33  ;;  %1122 = vst [vmem:[%s1892_s29 + $0x370] sm:$0xff] %v978_v34  ;;  %v723_v35 = vpop.f32.mrb[55].mxu0  ;;  %v980_v36 = vpop.f32.mrb[55].mxu1 }
 0x200   : >> { %1121 = vst [vmem:[%s1892_s29 + $0x368] sm:$0xff] %v723_v35  ;;  %1123 = vst [vmem:[%s1892_s29 + $0x378] sm:$0xff] %v980_v36 }
 0x202   : >> { %v727_v37 = vpop.f32.mrb[56].mxu0  ;;  %v984_v38 = vpop.f32.mrb[56].mxu1 }
 0x203   : >> { %1124 = vst [vmem:[%s1892_s29 + $0x380] sm:$0xff] %v727_v37  ;;  %1126 = vst [vmem:[%s1892_s29 + $0x390] sm:$0xff] %v984_v38  ;;  %v729_v40 = vpop.f32.mrb[57].mxu0  ;;  %v986_v41 = vpop.f32.mrb[57].mxu1 }
 0x204   : >> { %1125 = vst [vmem:[%s1892_s29 + $0x388] sm:$0xff] %v729_v40  ;;  %1127 = vst [vmem:[%s1892_s29 + $0x398] sm:$0xff] %v986_v41 }
 0x206   : >> { %v733_v42 = vpop.f32.mrb[58].mxu0  ;;  %v990_v43 = vpop.f32.mrb[58].mxu1 }
 0x207   : >> { %1128 = vst [vmem:[%s1892_s29 + $0x3a0] sm:$0xff] %v733_v42  ;;  %1130 = vst [vmem:[%s1892_s29 + $0x3b0] sm:$0xff] %v990_v43  ;;  %v735_v44 = vpop.f32.mrb[59].mxu0  ;;  %v992_v45 = vpop.f32.mrb[59].mxu1 }
 0x208   : >> { %1129 = vst [vmem:[%s1892_s29 + $0x3a8] sm:$0xff] %v735_v44  ;;  %1131 = vst [vmem:[%s1892_s29 + $0x3b8] sm:$0xff] %v992_v45 }
 0x20a   : >> { %v739_v39 = vpop.f32.mrb[60].mxu0  ;;  %v996_v5 = vpop.f32.mrb[60].mxu1  ;;  %166 = sbr.rel (!%p164_p6) target bundleno = 57 (0x39), region = 77 }
 0x20b   : >> { %1132 = vst [vmem:[%s1892_s29 + $0x3c0] sm:$0xff] %v739_v39  ;;  %1134 = vst [vmem:[%s1892_s29 + $0x3d0] sm:$0xff] %v996_v5  ;;  %v741_v46 = vpop.f32.mrb[61].mxu0  ;;  %v998_v47 = vpop.f32.mrb[61].mxu1 }
 0x20c   : >> { %1133 = vst [vmem:[%s1892_s29 + $0x3c8] sm:$0xff] %v741_v46  ;;  %1135 = vst [vmem:[%s1892_s29 + $0x3d8] sm:$0xff] %v998_v47 }
 0x20e   : >> { %v745_v48 = vpop.f32.mrb[62].mxu0  ;;  %v1002_v49 = vpop.f32.mrb[62].mxu1 }
 0x20f   : >> { %1136 = vst [vmem:[%s1892_s29 + $0x3e0] sm:$0xff] %v745_v48  ;;  %1138 = vst [vmem:[%s1892_s29 + $0x3f0] sm:$0xff] %v1002_v49  ;;  %v747_v50 = vpop.f32.mrb[63].mxu0  ;;  %v1004_v51 = vpop.f32.mrb[63].mxu1 }
 0x210   : >> { %1137 = vst [vmem:[%s1892_s29 + $0x3e8] sm:$0xff] %v747_v50  ;;  %1139 = vst [vmem:[%s1892_s29 + $0x3f8] sm:$0xff] %v1004_v51 }
 0x211   : > { %1460 = shalt.err (!%p1457_p8)
}
 0x212   : > { %s1461_s7 = scalar_lea.hbm %s2029_s5, 65536  ;;  %s1465_s23 = scalar_lea.hbm %s2080_s2, 262144 }
 0x213   : > { %p1462_p11 = scmp.ne.s32.totalorder %s2029_s5, %s1461_s7  ;;  %p1466_p0 = scmp.lt.u32.totalorder %s2029_s5, %s2080_s2 }
 0x214   : > { %p1467_p5 = scmp.lt.u32.totalorder %s1465_s23, %s1461_s7  ;;  %p1469_p9 = scmp.lt.u32.totalorder %s1461_s7, %s2029_s5 }
 0x215   : > { %p1463_p13 = pnand %p1462_p11, %p2091_p10 }
 0x216   : > { %p1468_p6 = por %p1467_p5, %p1466_p0 }
 0x217   : > { %p1464_p1 = pneg %p1463_p13 }
 0x218   : > { %p1470_p12 = por %p1469_p9, %p1468_p6 }
 0x21a   : > { %p1471_p2 = pnand %p1470_p12, %p1464_p1 }
 0x21c   : > { %1474 = shalt.err (!%p1471_p2)
}
 0x21d   : > { %s1527_s26 = smov 512   ;;  %s1528_s27 = smov 32  }
 0x21e   : > { %1359 = dma.vmem_to_hbm [thread:$0]  (%p2091_p10), %s2033_s6, 65536, %s2029_s5, %s2037_s8, %s1527_s26, %s1527_s26, %s1528_s27  }
 0x21f PF: > { %p1371_p3 = scmp.ge.s32.totalorder %s1517_s12, 2  ;;  %s1170_s28 = sand.u32 1, %s1505_s9  }
 0x220   : > { %p2092_p4 = scmp.ne.s32.totalorder %s2085_s20, 0  ;;  %s1171_s29 = scalar_lea.sflag [#allocation4], %s1170_s28 }
 0x222   : > { %p1366_p7 = pnand %p1371_p3, %p2092_p4 }
 0x224   : > { %1500 = dma.done.wait (!%p1366_p7), %s1171_s29, 65536  }
 0x225   : > { %1502 = vsyncadd (!%p1366_p7), %s1171_s29, 4294901760  ;;  %p13_p8 = scmp.ge.s32.totalorder %s1569_s15, 6   ;;  %s2093_s9 = smov %s1509_s10 }
 0x226   : > { %s2094_s10 = smov %s1513_s11  ;;  %s2095_s11 = smov %s1580_s18 }
 0x227   : > { %s2096_s12 = smov %s1569_s15  ;;  %15 = sbr.rel (!%p13_p8) target bundleno = 4 (0x4), region = 88 }
 0x22e   :  { %1176 = vsyncpa [#allocation3], 1 }
 0x22f   :  { %1178 = vsyncpa [#allocation3 + $0x1], 1 }
 0x230   :  { %1179 = vsyncpa [#allocation4], 1 }
 0x231   :  { %1181 = vsyncpa [#allocation4 + $0x1], 1 }

</bundles_post_ra>
